<compile_context>
chip_gen: v7x
topology: tpu7x:2x2x1
jax: 0.10.0
libtpu: 0.0.40
codegen_flags: <defaults>
</compile_context>

<pallas_src>
import jax
import jax.numpy as jnp
from jax.experimental import pallas as pl
from jax.experimental.pallas import tpu as pltpu


def _make_fml_kernel(hw, hw_pad):
    """Build the kernel for a given (valid HW, padded HW)."""

    def kernel(w_ref, fm_ref, out_ref):
        # w_ref  : (B, 1, C)       selected classifier rows  (input dtype)
        # fm_ref : (B, C, HW_pad)  flattened feature maps    (input dtype)
        # out_ref: (B, C, HW_pad)  localized feature maps
        fm = fm_ref[...]
        w = w_ref[...]

        # MXU: batched (1, C) x (C, HW_pad) -> (B, 1, HW_pad), f32 accumulation.
        heat = jnp.einsum("byc,bcs->bys", w, fm,
                          preferred_element_type=jnp.float32)

        # Per-sample min/max over the *valid* spatial positions only (padded
        # lanes hold zeros and must not pollute the normalization).
        if hw == hw_pad:
            h_min = jnp.min(heat, axis=-1, keepdims=True)
            h_max = jnp.max(heat, axis=-1, keepdims=True)
        else:
            lane = jax.lax.broadcasted_iota(jnp.int32, heat.shape, 2)
            valid = lane < hw
            h_min = jnp.min(jnp.where(valid, heat, jnp.inf),
                            axis=-1, keepdims=True)
            h_max = jnp.max(jnp.where(valid, heat, -jnp.inf),
                            axis=-1, keepdims=True)

        # Exact reciprocal keeps numerical parity with the torch reference; the
        # kernel is HBM-bound so the EUP approx variant buys nothing here.
        inv = pl.reciprocal(h_max - h_min + 1e-6, approx=False)
        heat_norm = (heat - h_min) * inv                    # (B, 1, HW_pad) f32

        # Broadcast multiply over channels in the input dtype.
        out_ref[...] = (fm * heat_norm.astype(fm.dtype)).astype(out_ref.dtype)

    return kernel


def _choose_block_batch(n, c, hw_pad, itemsize, max_block_bytes):
    """Largest sample-batch B that (a) divides N, (b) keeps the fm block under
    max_block_bytes, and (c) leaves >= 2 grid steps when N > 1 (so the grid can
    shard across two TensorCores on v7x / megacore)."""
    per_sample = c * hw_pad * itemsize
    b = max(1, int(max_block_bytes // per_sample))
    b = min(b, n)
    while n % b != 0:
        b -= 1
    if b == n and n > 1:
        # largest proper divisor of n -> at least 2 grid steps
        b = next(d for d in range(n // 2, 0, -1) if n % d == 0)
    return b


def feature_map_location(features_map, pids, classifier_weight,
                         *, max_block_bytes=2 * 1024 * 1024):
    """features_map: (N, C, H, W); pids: (N,) int; classifier_weight: (K, C).
    Returns localized feature map (N, C, H, W)."""
    n, c, h, w = features_map.shape
    hw = h * w
    hw_pad = ((hw + 127) // 128) * 128
    dtype = features_map.dtype

    # Gather per-sample classifier rows, shaped (N, 1, C) so the kernel sees a
    # proper batched (1, C) x (C, HW) matmul for the MXU.
    selected = jnp.take(classifier_weight, pids, axis=0)
    selected = selected.reshape(n, 1, c).astype(dtype)

    fm_flat = features_map.reshape(n, c, hw)
    if hw_pad != hw:
        fm_flat = jnp.pad(fm_flat, ((0, 0), (0, 0), (0, hw_pad - hw)))

    itemsize = jnp.dtype(dtype).itemsize
    b = _choose_block_batch(n, c, hw_pad, itemsize, max_block_bytes)
    grid = (n // b,)

    kernel = _make_fml_kernel(hw, hw_pad)

    out_flat = pl.pallas_call(
        kernel,
        out_shape=jax.ShapeDtypeStruct((n, c, hw_pad), dtype),
        grid_spec=pltpu.PrefetchScalarGridSpec(
            num_scalar_prefetch=0,
            grid=grid,
            in_specs=[
                pl.BlockSpec((b, 1, c), lambda i: (i, 0, 0)),
                pl.BlockSpec((b, c, hw_pad), lambda i: (i, 0, 0)),
            ],
            out_specs=pl.BlockSpec((b, c, hw_pad), lambda i: (i, 0, 0)),
        ),
        compiler_params=pltpu.CompilerParams(
            dimension_semantics=("parallel",),
            vmem_limit_bytes=32 * 1024 * 1024,
        ),
    )(selected, fm_flat)

    if hw_pad != hw:
        out_flat = out_flat[:, :, :hw]
    return out_flat.reshape(n, c, h, w)


def _reference(features_map, pids, classifier_weight):
    """Pure-JAX reference mirroring the PyTorch forward (exact f32 math)."""
    n, c, h, w = features_map.shape
    sel = classifier_weight[pids].astype(jnp.float32)
    fm = features_map.reshape(n, c, h * w).astype(jnp.float32)
    heat = jnp.einsum("nc,ncs->ns", sel, fm, precision="highest")
    hmin = heat.min(axis=1, keepdims=True)
    hmax = heat.max(axis=1, keepdims=True)
    heat = (heat - hmin) / (hmax - hmin + 1e-6)
    out = features_map.astype(jnp.float32) * heat.reshape(n, 1, h, w)
    return out.astype(features_map.dtype)


if __name__ == "__main__":
    key = jax.random.PRNGKey(0)
    k1, k2, k3 = jax.random.split(key, 3)

    N, C, H, W = 2, 4, 16, 16
    NUM_CLASSES = 8

    features_map = jax.random.normal(k1, (N, C, H, W), dtype=jnp.float32)
    classifier_weight = jax.random.normal(k2, (NUM_CLASSES, C), dtype=jnp.float32)
    pids = jax.random.randint(k3, (N,), 0, NUM_CLASSES, dtype=jnp.int32)

    out = feature_map_location(features_map, pids, classifier_weight)
    out = jax.block_until_ready(out)

    ref = _reference(features_map, pids, classifier_weight)
    assert out.shape == (N, C, H, W)
    # Small headroom over f32 rounding for the MXU accumulation path.
    assert jnp.allclose(out, ref, atol=1e-4, rtol=1e-4), "mismatch vs reference"

    print("KERNEL_OK")
</pallas_src>

<mosaic_0001>
module attributes {stable_mosaic.version = 11 : i64} {
  func.func @kernel(%arg0: i32, %arg1: memref<1x1x4xf32, #tpu.memory_space<vmem>>, %arg2: memref<1x4x256xf32, #tpu.memory_space<vmem>>, %arg3: memref<1x4x256xf32, #tpu.memory_space<vmem>>) attributes {dimension_semantics = [#tpu.dimension_semantics<parallel>], iteration_bounds = array<i64: 2>, scalar_prefetch = 0 : i64, scratch_operands = 0 : i64, tpu.core_type = #tpu.core_type<tc>, window_params = [{transform_indices = @transform_0, window_bounds = array<i64: 1, 1, 4>}, {transform_indices = @transform_1, window_bounds = array<i64: 1, 4, 256>}, {transform_indices = @transform_2, window_bounds = array<i64: 1, 4, 256>}]} {
    %c0 = arith.constant 0 : index
    %c0_0 = arith.constant 0 : index
    %c0_1 = arith.constant 0 : index
    %0 = vector.load %arg2[%c0, %c0_0, %c0_1] : memref<1x4x256xf32, #tpu.memory_space<vmem>>, vector<1x4x256xf32>
    %c0_2 = arith.constant 0 : index
    %c0_3 = arith.constant 0 : index
    %c0_4 = arith.constant 0 : index
    %1 = vector.load %arg1[%c0_2, %c0_3, %c0_4] : memref<1x1x4xf32, #tpu.memory_space<vmem>>, vector<1x1x4xf32>
    "tpu.trace_start"() <{level = 10 : i32, message = "byc,bcs->bys"}> : () -> ()
    %cst = arith.constant dense<0.000000e+00> : vector<1x1x256xf32>
    %2 = tpu.matmul %1, %0, %cst {dimension_numbers = #tpu.dot_dimension_numbers<[2], [1], [1], [2], [0, 0, 0, 1, 1, 2], [0], [0]>} : vector<1x1x4xf32>, vector<1x4x256xf32>, vector<1x1x256xf32> -> vector<1x1x256xf32>
    "tpu.trace_stop"() : () -> ()
    %cst_5 = arith.constant dense<0x7F800000> : vector<1x1xf32>
    %3 = vector.multi_reduction <minimumf>, %2, %cst_5 [2] : vector<1x1x256xf32> to vector<1x1xf32>
    %4 = vector.shape_cast %3 : vector<1x1xf32> to vector<1x1x1xf32>
    %cst_6 = arith.constant dense<0xFF800000> : vector<1x1xf32>
    %5 = vector.multi_reduction <maximumf>, %2, %cst_6 [2] : vector<1x1x256xf32> to vector<1x1xf32>
    %6 = vector.shape_cast %5 : vector<1x1xf32> to vector<1x1x1xf32>
    %7 = arith.subf %6, %4 : vector<1x1x1xf32>
    %cst_7 = arith.constant 9.99999997E-7 : f32
    %8 = vector.broadcast %cst_7 : f32 to vector<1x1x1xf32>
    %9 = arith.addf %7, %8 : vector<1x1x1xf32>
    %10 = tpu.reciprocal %9 : vector<1x1x1xf32> -> vector<1x1x1xf32>
    %11 = vector.broadcast %4 : vector<1x1x1xf32> to vector<1x1x256xf32>
    %12 = arith.subf %2, %11 : vector<1x1x256xf32>
    %13 = vector.broadcast %10 : vector<1x1x1xf32> to vector<1x1x256xf32>
    %14 = arith.mulf %12, %13 : vector<1x1x256xf32>
    %15 = vector.broadcast %14 : vector<1x1x256xf32> to vector<1x4x256xf32>
    %16 = arith.mulf %0, %15 : vector<1x4x256xf32>
    %c0_8 = arith.constant 0 : index
    %c0_9 = arith.constant 0 : index
    %c0_10 = arith.constant 0 : index
    %17 = vector.load %arg3[%c0_8, %c0_9, %c0_10] : memref<1x4x256xf32, #tpu.memory_space<vmem>>, vector<1x4x256xf32>
    tpu.vector_store %arg3[%c0_8, %c0_9, %c0_10], %16 {strides = array<i32>} : memref<1x4x256xf32, #tpu.memory_space<vmem>>, vector<1x4x256xf32>,
    return
  }
  func.func @transform_0(%arg0: i32) -> (i32, i32, i32) {
    %c0_i32 = arith.constant 0 : i32
    %c0_i32_0 = arith.constant 0 : i32
    %c0_i32_1 = arith.constant 0 : i32
    return %arg0, %c0_i32, %c0_i32_0 : i32, i32, i32
  }
  func.func @transform_1(%arg0: i32) -> (i32, i32, i32) {
    %c0_i32 = arith.constant 0 : i32
    %c0_i32_0 = arith.constant 0 : i32
    %c0_i32_1 = arith.constant 0 : i32
    return %arg0, %c0_i32, %c0_i32_0 : i32, i32, i32
  }
  func.func @transform_2(%arg0: i32) -> (i32, i32, i32) {
    %c0_i32 = arith.constant 0 : i32
    %c0_i32_0 = arith.constant 0 : i32
    %c0_i32_1 = arith.constant 0 : i32
    return %arg0, %c0_i32, %c0_i32_0 : i32, i32, i32
  }
}

</mosaic_0001>

<bundles_post_ra>
// kernel: tpu_custom_call.1
= control target key start
LH: loop header
LB: loop body
LE: loop exit
PB: predicated region body
PF: predicated region fallthrough
CT: control target
= control target key end

     0   :  { %7 = vsyncpa [#allocation3], 0  ;;  %s849_s0 = inlined_call_operand.hbm [shape: f32[2,1,4], index: 0, kind: input, shape index: {}]   ;;  %s850_s1 = inlined_call_operand.hbm [shape: f32[2,4,256], index: 1, kind: input, shape index: {}]   ;;  %s851_s2 = inlined_call_operand.hbm [shape: f32[2,4,256], index: 2, kind: output, shape index: {}]  }
   0x1   :  { %9 = vsyncpa [#allocation3 + $0x1], 0 }
   0x2   :  { %10 = vsyncpa [#allocation6], 0 }
   0x3   :  { %12 = vsyncpa [#allocation6 + $0x1], 0 }
   0x4   :  { %13 = vsyncpa [#allocation4], 0 }
   0x5   :  { %15 = vsyncpa [#allocation4 + $0x1], 0  ;;  %s641_s9 = smov 0   ;;  %s643_s10 = smov 0  }
   0x6   :  { %s645_s11 = smov 0   ;;  %s647_s12 = smov 0  }
   0x7 LB: > { %s662_s13 = sadd.s32 4294967295, %s620_s12   ;;  %s415_s14 = sadd.s32 4294967294, %s620_s12   ;;  %s620_s12 = sphi %s647_s12, %s870_s12   ;;  %s616_s11 = sphi %s645_s11, %s869_s11   ;;  %s612_s10 = sphi %s643_s10, %s868_s10   ;;  %s608_s9 = sphi %s641_s9, %s867_s9  }
   0x8   : > { %s666_s15 = sadd.s32 1, %s620_s12   ;;  %s28_s16 = sadd.s32 1, %s616_s11 }
   0x9   : > { %s25_s17 = ssub.s32 %s620_s12, %s666_s15  ;;  %p35_p0 = scmp.ne.s32.totalorder %s616_s11, %s612_s10 }
   0xa   : > { %p26_p1 = scmp.eq.s32.totalorder %s25_s17, 0  ;;  %p36_p2 = scmp.eq.s32.totalorder %s620_s12, 0 }
   0xb   : > { %p41_p3 = scmp.ne.s32.totalorder %s612_s10, %s608_s9  ;;  %p42_p4 = scmp.eq.s32.totalorder %s662_s13, 0 }
   0xc   : > { %s678_s18 = scalar_select %p26_p1, %s616_s11, %s28_s16  }
   0xd   : > { %p680_p5 = por %p36_p2, %p35_p0  ;;  %p684_p6 = por %p42_p4, %p41_p3 }
   0xe   : > { %p91_p7 = scmp.eq.s32.totalorder %s662_s13, 1  ;;  %p97_p8 = scmp.eq.s32.totalorder %s415_s14, 1 }
   0xf   : > { %s855_s20 = scalar_select %p684_p6, 1, 0 }
  0x10   : > { %p452_p10 = scmp.lt.s32.totalorder %s620_s12, 2  ;;  %p691_p11 = por %p91_p7, %p35_p0 }
  0x11   : > { %p695_p12 = por %p97_p8, %p41_p3  ;;  %s700_s23 = sand.u32 1, %s616_s11  }
  0x12   : > { %s856_s21 = scalar_select %p691_p11, 1, 0 }
  0x13   : > { %s857_s22 = scalar_select %p695_p12, 1, 0 }
  0x14   : > { %s418_s24 = sshll.u32 %s620_s12, 4  ;;  %s120_s28 = scalar_lea.vmem [#allocation2], %s700_s23 }
  0x15   : > { %s706_s27 = scalar_lea.hbm %s849_s0, %s418_s24  ;;  %s127_s29 = sshll.u32 %s120_s28, 4  ;;  %s709_s29 = int_to_ptr.vmem [resolvable:$true] %s127_s29 }
  0x16   : > { %p713_p13 = pnand %p452_p10, %p680_p5  ;;  %s118_s3 = scalar_lea.sflag [#allocation3], %s700_s23 }
  0x17   : > { %s490_s4 = scalar_lea.hbm %s706_s27, 16  ;;  %s495_s7 = scalar_lea.hbm %s849_s0, 32 }
  0x18   : > { %p491_p2 = scmp.ne.s32.totalorder %s706_s27, %s490_s4  ;;  %p492_p3 = pneg %p713_p13 }
  0x19   : > { %p496_p5 = scmp.lt.u32.totalorder %s706_s27, %s849_s0  ;;  %p497_p8 = scmp.lt.u32.totalorder %s495_s7, %s490_s4 }
  0x1a   : > { %p493_p4 = pnand %p492_p3, %p491_p2  ;;  %p499_p9 = scmp.lt.u32.totalorder %s490_s4, %s706_s27 }
  0x1b   : > { %p498_p10 = por %p497_p8, %p496_p5 }
  0x1c   : > { %p494_p7 = pneg %p493_p4 }
  0x1d   : > { %p500_p0 = por %p499_p9, %p498_p10 }
  0x1f   : > { %p501_p1 = pnand %p500_p0, %p494_p7 }
  0x21   : > { %504 = shalt.err (!%p501_p1)
}
  0x22   : > { %s505_s16 = scalar_lea.vmem %s709_s29, 16  ;;  %s622_s17 = smov [#allocation2]  }
  0x23   : > { %p506_p2 = scmp.ne.s32.totalorder %s709_s29, %s505_s16  ;;  %s510_s19 = sshll.u32 %s622_s17, 4  ;;  %s511_s19 = int_to_ptr.vmem [resolvable:$false] %s510_s19 }
  0x24   : > { %s512_s24 = scalar_lea.vmem %s511_s19, 32  ;;  %p513_p11 = scmp.lt.s32.totalorder %s709_s29, %s511_s19 }
  0x25   : > { %p508_p4 = pnand %p506_p2, %p492_p3  ;;  %p514_p5 = scmp.lt.s32.totalorder %s512_s24, %s505_s16 }
  0x27   : > { %p509_p12 = pneg %p508_p4  ;;  %p515_p8 = por %p514_p5, %p513_p11 }
  0x29   : > { %p516_p9 = pnand %p515_p8, %p509_p12 }
  0x2b   : > { %519 = shalt.err (!%p516_p9)
}
  0x2c   : > { %444 = dma.hbm_to_vmem [thread:$0]  (!%p713_p13), %s706_s27, 16, %s709_s29, %s118_s3  }
  0x2d   : > { %p859_p0 = scmp.lt.s32.totalorder %s620_s12, 3  ;;  %p860_p1 = scmp.ge.s32.totalorder %s620_s12, 1 }
  0x2e   : > { %s419_s26 = sshll.u32 %s700_s23, 3  ;;  %s433_s28 = sshll.u32 %s620_s12, 7 }
  0x2f   : > { %p749_p7 = pnand %p860_p1, %p859_p0  ;;  %s758_s6 = scalar_lea.hbm %s850_s1, %s433_s28 }
  0x30   : > { %s138_s7 = scalar_lea.vmem [#allocation5], %s419_s26  ;;  %s135_s27 = scalar_lea.sflag [#allocation6], %s700_s23 }
  0x31   : > { %s861_s25 = scalar_select %p749_p7, 1, 0 }
  0x32   : > { %s146_s8 = sshll.u32 %s138_s7, 4  ;;  %s520_s29 = scalar_lea.hbm %s758_s6, 128  ;;  %s147_s8 = int_to_ptr.vmem [resolvable:$true] %s146_s8 }
  0x33   : > { %p521_p11 = scmp.ne.s32.totalorder %s758_s6, %s520_s29  ;;  %s525_s16 = scalar_lea.hbm %s850_s1, 256 }
  0x34   : > { %p526_p2 = scmp.lt.u32.totalorder %s758_s6, %s850_s1  ;;  %p527_p4 = scmp.lt.u32.totalorder %s525_s16, %s520_s29 }
  0x35   : > { %p523_p12 = pnand %p521_p11, %p492_p3  ;;  %p529_p8 = scmp.lt.u32.totalorder %s520_s29, %s758_s6 }
  0x36   : > { %p528_p5 = por %p527_p4, %p526_p2 }
  0x37   : > { %p524_p10 = pneg %p523_p12 }
  0x38   : > { %p530_p9 = por %p529_p8, %p528_p5 }
  0x3a   : > { %p531_p0 = pnand %p530_p9, %p524_p10 }
  0x3c   : > { %534 = shalt.err (!%p531_p0)
}
  0x3d   : > { %s535_s23 = scalar_lea.vmem %s147_s8, 128  ;;  %s623_s24 = smov [#allocation5]  }
  0x3e   : > { %p536_p1 = scmp.ne.s32.totalorder %s147_s8, %s535_s23  ;;  %s540_s26 = sshll.u32 %s623_s24, 4  ;;  %s541_s26 = int_to_ptr.vmem [resolvable:$false] %s540_s26 }
  0x3f   : > { %s542_s28 = scalar_lea.vmem %s541_s26, 256  ;;  %p543_p6 = scmp.lt.s32.totalorder %s147_s8, %s541_s26 }
  0x40   : > { %p538_p11 = pnand %p536_p1, %p492_p3  ;;  %p544_p7 = scmp.lt.s32.totalorder %s542_s28, %s535_s23 }
  0x42   : > { %p539_p12 = pneg %p538_p11  ;;  %p545_p2 = por %p544_p7, %p543_p6 }
  0x44   : > { %p546_p4 = pnand %p545_p2, %p539_p12 }
  0x46   : > { %549 = shalt.err (!%p546_p4)
}
  0x47   : > { %447 = dma.hbm_to_vmem [thread:$0]  (!%p713_p13), %s758_s6, 128, %s147_s8, %s135_s27  }
  0x48   : > { %p862_p10 = scmp.ne.s32.totalorder %s861_s25, 0 }
  0x49   : > { %s783_s4 = sand.u32 (!%p862_p10), 1, %s612_s10   ;;  %p863_p3 = scmp.ne.s32.totalorder (!%p862_p10), %s855_s20, 0 }
  0x4a   : > { %155 = sbr.rel (%p862_p10) target bundleno = 489 (0x1e9), region = 28  ;;  %s158_s5 = scalar_lea.sflag (!%p862_p10), [#allocation3], %s783_s4 }
  0x4b   : > { %s160_s7 = scalar_lea.vmem (!%p862_p10), [#allocation2], %s783_s4 }
  0x51   : > { %595 = dma.done.wait (%p863_p3), %s158_s5, 16  }
  0x52   : > { %597 = vsyncadd (%p863_p3), %s158_s5, 4294967280  ;;  %s423_s30 = sshll.u32 %s783_s4, 3  ;;  %s166_s25 = scalar_lea.sflag [#allocation6], %s783_s4 }
  0x53   : > { %s169_s6 = scalar_lea.vmem [#allocation5], %s423_s30 }
  0x54   : > { %599 = dma.done.wait (%p863_p3), %s166_s25, 128  }
  0x55   : > { %601 = vsyncadd (%p863_p3), %s166_s25, 4294967168  ;;  %v624_v0 = vmov 0.0   ;;  %v194_v1 = vld [vmem:[%s169_s6] sm:$0xff]  ;;  %vm202_vm0 = vcmask 1043456   ;;  %v195_v3 = vld [vmem:[%s160_s7] sm:$0x1]  ;;  %v296_v16 = vlaneseq }
  0x56   : > { %271 = vmatprep.mubr.f32.mxu0 %v624_v0  ;;  %v197_v2 = vcombine.high %v194_v1, %v194_v1  ;;  %vm198_vm1 = vcmask 31744   ;;  %vm278_vm2 = vcmask 1040384   ;;  %s434_s20 = sshll.u32 %s662_s13, 7  ;;  %s193_s8 = scalar_lea.vmem [#allocation7], %s423_s30 }
  0x57   : > { %v297_v17 = vshrl.u32 %v296_v16, 7  ;;  %s325_s27 = sshll.u32 %s193_s8, 4  ;;  %s805_s14 = scalar_lea.hbm %s851_s2, %s434_s20  ;;  %s807_s27 = int_to_ptr.vmem [resolvable:$true] %s325_s27 }
  0x58   : > { %425 = vmatprep.subr.msk.mxu0 %vm202_vm0, %v197_v2  ;;  %s311_s16 = scalar_lea.sflag [#allocation4], %s783_s4  ;;  %s550_s17 = scalar_lea.vmem %s807_s27, 128 }
  0x59   : > { %426 = vmatpush1.msk.msra.mxu0 %vm202_vm0, %v194_v1  ;;  %v298_v20 = vsub.s32 0, %v297_v17  ;;  %p551_p6 = scmp.ne.s32.totalorder %s807_s27, %s550_s17  ;;  %p864_p13 = scmp.ne.s32.totalorder %s856_s21, 0 }
  0x5a   : > { %427 = vmatmul.mubr.msk.f32.vlgmr.msra.gmra.mrb[0].mxu0 %vm198_vm1, %v195_v3  ;;  %s625_s13 = smov [#allocation7]  }
  0x5b   : > { %p552_p7 = pnand %p551_p6, %p864_p13  ;;  %s554_s19 = sshll.u32 %s625_s13, 4  ;;  %s555_s19 = int_to_ptr.vmem [resolvable:$false] %s554_s19 }
  0x5c   : > { %s556_s23 = scalar_lea.vmem %s555_s19, 256  ;;  %p557_p8 = scmp.lt.s32.totalorder %s807_s27, %s555_s19 }
  0x5d   : > { %p553_p5 = pneg %p552_p7  ;;  %p558_p9 = scmp.lt.s32.totalorder %s556_s23, %s550_s17 }
  0x5f   : > { %p559_p0 = por %p558_p9, %p557_p8 }
  0x61   : > { %p560_p1 = pnand %p559_p0, %p553_p5 }
 0x12d   : > { %v273_v4 = vpop.f32.mrb[0].mxu0 }
 0x12e   : > { %v275_v5 = vpop.f32.mrb[1].mxu0  ;;  %v279_v6 = vsel %vm278_vm2, %v273_v4, inf  ;;  %v284_v7 = vsel %vm278_vm2, %v273_v4, -inf }
 0x12f   : > { %v285_v8 = vsel %vm278_vm2, %v275_v5, -inf  ;;  %v280_v9 = vsel %vm278_vm2, %v275_v5, inf }
 0x130   : > { %v281_v10 = vmin.f32 %v279_v6, %v280_v9  ;;  %v286_v11 = vmax.f32 %v284_v7, %v285_v8 }
 0x132   : > { %282 = vmin.xlane.f32.xlu0 %v281_v10 }
 0x136   : > { %287 = vmax.xlane.f32.xlu0 %v286_v11 }
 0x1bf   : > { %v283_v12 = vpop.xlane.xlu0 %282 }
 0x1c0   : > { %v292_v18 = vsub.f32 %v273_v4, %v283_v12  ;;  %v293_v19 = vsub.f32 %v275_v5, %v283_v12 }
 0x1c3   : > { %v288_v13 = vpop.xlane.xlu0 %287 }
 0x1c4   : > { %v289_v14 = vsub.f32 %v288_v13, %v283_v12 }
 0x1c6   : > { %v290_v15 = vadd.f32 1e-06, %v289_v14 }
 0x1c8   : > { %488 = vrcp.f32 %v290_v15 }
 0x1d2   : > { %v489_v21 = vpop.eup %488 }
 0x1d3   : > { %v294_v22 = vmul.f32 %v489_v21, %v292_v18  ;;  %v295_v23 = vmul.f32 %v489_v21, %v293_v19 }
 0x1d5   : > { %v299_v24 = vrot.slane %v294_v22, %v298_v20  ;;  %v303_v25 = vrot.slane %v295_v23, %v298_v20 }
 0x1d7   : > { %v306_v26 = vcombine.low %v299_v24, %v303_v25 }
 0x1d9   : > { %v308_v27 = vmul.f32 %v306_v26, %v194_v1 }
 0x1db   : > { %309 = vst [vmem:[%s193_s8] sm:$0xff] %v308_v27 }
 0x1dc   : > { %563 = shalt.err (!%p560_p1)
}
 0x1dd   : > { %s564_s24 = scalar_lea.hbm %s805_s14, 128  ;;  %s568_s4 = scalar_lea.hbm %s851_s2, 256 }
 0x1de   : > { %p565_p11 = scmp.ne.s32.totalorder %s805_s14, %s564_s24  ;;  %p569_p4 = scmp.lt.u32.totalorder %s805_s14, %s851_s2 }
 0x1df   : > { %p570_p10 = scmp.lt.u32.totalorder %s568_s4, %s564_s24  ;;  %p572_p6 = scmp.lt.u32.totalorder %s564_s24, %s805_s14 }
 0x1e0   : > { %p566_p12 = pnand %p565_p11, %p864_p13 }
 0x1e1   : > { %p571_p3 = por %p570_p10, %p569_p4 }
 0x1e2   : > { %p567_p2 = pneg %p566_p12 }
 0x1e3   : > { %p573_p7 = por %p572_p6, %p571_p3 }
 0x1e5   : > { %p574_p5 = pnand %p573_p7, %p567_p2 }
 0x1e7   : > { %577 = shalt.err (!%p574_p5)
}
 0x1e8   : > { %439 = dma.vmem_to_hbm [thread:$0]  (%p864_p13), %s807_s27, 128, %s805_s14, %s311_s16  }
 0x1e9 PF: > { %s337_s30 = sand.u32 1, %s608_s9   ;;  %p865_p8 = scmp.ne.s32.totalorder %s857_s22, 0 }
 0x1ea   : > { %p866_p9 = scmp.ge.s32.totalorder %s620_s12, 2  ;;  %s338_s25 = scalar_lea.sflag [#allocation4], %s337_s30 }
 0x1ec   : > { %p449_p0 = pnand %p866_p9, %p865_p8 }
 0x1ee   : > { %603 = dma.done.wait (!%p449_p0), %s338_s25, 128  }
 0x1ef   : > { %605 = vsyncadd (!%p449_p0), %s338_s25, 4294967168  ;;  %p18_p1 = scmp.ge.s32.totalorder %s666_s15, 4   ;;  %s867_s9 = smov %s612_s10 }
 0x1f0   : > { %s868_s10 = smov %s616_s11  ;;  %s869_s11 = smov %s678_s18 }
 0x1f1   : > { %s870_s12 = smov %s666_s15  ;;  %20 = sbr.rel (!%p18_p1) target bundleno = 7 (0x7), region = 86 }
 0x1f8   :  { %343 = vsyncpa [#allocation3], 1 }
 0x1f9   :  { %345 = vsyncpa [#allocation3 + $0x1], 1 }
 0x1fa   :  { %346 = vsyncpa [#allocation6], 1 }
 0x1fb   :  { %348 = vsyncpa [#allocation6 + $0x1], 1 }
 0x1fc   :  { %349 = vsyncpa [#allocation4], 1 }
 0x1fd   :  { %351 = vsyncpa [#allocation4 + $0x1], 1 }

</bundles_post_ra>
